<compile_context>
chip_gen: v6e
topology: v6e:2x2x1
jax: 0.10.0
libtpu: 0.0.40
codegen_flags: <defaults>
</compile_context>

<pallas_src>
import jax
import jax.numpy as jnp
import numpy as np
from jax.experimental import pallas as pl
from jax.experimental.pallas import tpu as pltpu

GROUP_ORDER = 16                      # |C4 x C4|
FLAT = GROUP_ORDER * GROUP_ORDER      # 256 == 2 * 128 lanes -> lane-dense rows


# ----------------------------------------------------------------------------
# Host-side constant construction (identical semantics to the PyTorch module).
# ----------------------------------------------------------------------------
def _group_mult(a: int, b: int) -> int:
    i1, j1 = divmod(a, 4)
    i2, j2 = divmod(b, 4)
    return 4 * ((i1 + i2) % 4) + ((j1 + j2) % 4)


def _reference_table(dtype=np.float32) -> np.ndarray:
    """(16,16,16) table; table[a] == PyTorch M[a] (left-multiplication perm matrix)."""
    tbl = np.zeros((GROUP_ORDER, GROUP_ORDER, GROUP_ORDER), dtype=dtype)
    for a in range(GROUP_ORDER):
        for b in range(GROUP_ORDER):
            tbl[a, _group_mult(a, b), b] = 1.0
    return tbl


# ----------------------------------------------------------------------------
# Pallas forward kernel: scalar-prefetch row selection of the lane-dense slab.
# ----------------------------------------------------------------------------
def _row_select_kernel(idx_ref, row_ref, out_ref):
    # idx_ref : SMEM (1,) int32 scalar-prefetch — selection already happened in
    #           the BlockSpec index_map, so it is unused in the body.
    # row_ref : VMEM (1, 1, 256) — the selected row, DMA'd by the pipeline.
    # out_ref : VMEM (1, 256)    — lane-dense output (unmasked vst).
    del idx_ref
    out_ref[...] = row_ref[0]


@jax.jit
def _select_row_lane_dense(table_rows, idx):
    """table_rows: (16, 1, 256) slab; idx: int scalar -> (1, 256) lane-dense row."""
    idx = jnp.clip(jnp.asarray(idx, jnp.int32).reshape((1,)), 0, GROUP_ORDER - 1)
    return pl.pallas_call(
        _row_select_kernel,
        out_shape=jax.ShapeDtypeStruct((1, FLAT), table_rows.dtype),
        grid_spec=pltpu.PrefetchScalarGridSpec(
            num_scalar_prefetch=1,
            grid=(1,),
            in_specs=[
                # Data-dependent row selection: only the chosen 1 KiB row is DMA'd.
                pl.BlockSpec((1, 1, FLAT), lambda i, idx_ref: (idx_ref[0], 0, 0)),
            ],
            out_specs=pl.BlockSpec((1, FLAT), lambda i, idx_ref: (0, 0)),
        ),
    )(idx, table_rows)


# ----------------------------------------------------------------------------
# Module wrapper.
# ----------------------------------------------------------------------------
class C4xC4RegularRepresentation:
    """JAX/Pallas analogue of the PyTorch module: precompute once, select on forward."""

    def __init__(self, dtype=jnp.float32):
        self.dtype = dtype
        # 16 KiB compile-time constant: build on host, push to device once.
        host = _reference_table(np.float32)                      # exact 0/1
        self.table = jax.device_put(jnp.asarray(host, dtype=dtype))          # (16,16,16)
        self.table_flat = self.table.reshape(GROUP_ORDER, FLAT)              # (16,256) lane-dense slab
        self._table_rows = self.table_flat.reshape(GROUP_ORDER, 1, FLAT)     # kernel-side layout

    # --- group helpers (pure python, mirrors the PyTorch API) ---------------
    def group_mult(self, a: int, b: int) -> int:
        return _group_mult(a, b)

    def inverse(self, a: int) -> int:
        i, j = divmod(a, 4)
        return 4 * ((-i) % 4) + ((-j) % 4)

    def mapping(self) -> dict:
        return {4 * i + j: f"r^{i} s^{j}" for i in range(4) for j in range(4)}

    # --- forward -------------------------------------------------------------
    def forward_flat(self, idx):
        """Lane-dense (1, 256) row for group element idx — preferred for fusion."""
        return _select_row_lane_dense(self._table_rows, idx)

    def __call__(self, idx):
        """forward(idx): the 16x16 left-multiplication matrix for element idx."""
        return self.forward_flat(idx).reshape(GROUP_ORDER, GROUP_ORDER)


if __name__ == "__main__":
    # Deterministic "input": a group-element index drawn from PRNGKey(0).
    key = jax.random.PRNGKey(0)
    idx = jax.random.randint(key, (), 0, GROUP_ORDER, dtype=jnp.int32)

    rep = C4xC4RegularRepresentation()                  # host constant + cached slab
    out = jax.block_until_ready(rep(idx))               # forward: one Pallas row-select

    ref_table = _reference_table()

    # Cached device table matches the reference exactly.
    table_ok = np.array_equal(np.asarray(rep.table), ref_table)

    # Pallas forward path matches for the sampled index and for all 16 elements.
    fwd_ok = np.array_equal(np.asarray(out), ref_table[int(idx)])
    all_ok = all(
        np.array_equal(np.asarray(jax.block_until_ready(rep(a))), ref_table[a])
        for a in range(GROUP_ORDER)
    )

    if (table_ok and fwd_ok and all_ok
            and out.shape == (GROUP_ORDER, GROUP_ORDER)
            and out.dtype == jnp.float32):
        print("KERNEL_OK")
</pallas_src>

<mosaic_0001>
module attributes {stable_mosaic.version = 11 : i64} {
  func.func @_row_select_kernel(%arg0: i32, %arg1: memref<1xi32, #tpu.memory_space<smem>>, %arg2: memref<1x1x256xf32, #tpu.memory_space<vmem>>, %arg3: memref<1x256xf32, #tpu.memory_space<vmem>>) attributes {dimension_semantics = [#tpu.dimension_semantics<arbitrary>], iteration_bounds = array<i64: 1>, scalar_prefetch = 1 : i64, scratch_operands = 0 : i64, tpu.core_type = #tpu.core_type<tc>, window_params = [{transform_indices = @transform_0, window_bounds = array<i64: 1, 1, 256>}, {pipeline_mode = #tpu.pipeline_mode<synchronous>, transform_indices = @transform_1, window_bounds = array<i64: 1, 256>}]} {
    %c0 = arith.constant 0 : index
    %c0_0 = arith.constant 0 : index
    %c0_1 = arith.constant 0 : index
    %0 = vector.load %arg2[%c0, %c0_0, %c0_1] : memref<1x1x256xf32, #tpu.memory_space<vmem>>, vector<1x1x256xf32>
    %1 = vector.shape_cast %0 : vector<1x1x256xf32> to vector<1x256xf32>
    %c0_2 = arith.constant 0 : index
    %c0_3 = arith.constant 0 : index
    %2 = vector.load %arg3[%c0_2, %c0_3] : memref<1x256xf32, #tpu.memory_space<vmem>>, vector<1x256xf32>
    tpu.vector_store %arg3[%c0_2, %c0_3], %1 {strides = array<i32>} : memref<1x256xf32, #tpu.memory_space<vmem>>, vector<1x256xf32>,
    return
  }
  func.func @transform_0(%arg0: i32, %arg1: memref<1xi32, #tpu.memory_space<smem>>) -> (i32, i32, i32) {
    %c0 = arith.constant 0 : index
    %0 = memref.load %arg1[%c0] : memref<1xi32, #tpu.memory_space<smem>>
    %c0_i32 = arith.constant 0 : i32
    %c0_i32_0 = arith.constant 0 : i32
    %c0_i32_1 = arith.constant 0 : i32
    return %0, %c0_i32, %c0_i32_0 : i32, i32, i32
  }
  func.func @transform_1(%arg0: i32, %arg1: memref<1xi32, #tpu.memory_space<smem>>) -> (i32, i32) {
    %c0_i32 = arith.constant 0 : i32
    %c0_i32_0 = arith.constant 0 : i32
    %c0_i32_1 = arith.constant 0 : i32
    return %c0_i32, %c0_i32_0 : i32, i32
  }
}

</mosaic_0001>

<bundles_post_ra>
// kernel: _select_row_lane_dense.1
= control target key start
LH: loop header
LB: loop body
LE: loop exit
PB: predicated region body
PF: predicated region fallthrough
CT: control target
= control target key end

     0   :  { %8 = vsyncpa [#allocation5], 0  ;;  %s134_s0 = inlined_call_operand.<no memory space> [shape: s32[1], index: 0, kind: input, shape index: {}]   ;;  %s135_s1 = inlined_call_operand.hbm [shape: f32[16,1,256], index: 1, kind: input, shape index: {}]   ;;  %s136_s2 = inlined_call_operand.hbm [shape: f32[1,256], index: 2, kind: output, shape index: {}]  }
   0x1   :  { %9 = vsyncpa [#allocation6], 0  ;;  %s53_s11 = sshll.u32 %s134_s0, 5  ;;  %s102_s15 = smov [#allocation4]  }
   0x2   :  { %s18_s14 = scalar_lea.hbm %s135_s1, %s53_s11  ;;  %s20_s16 = sshll.u32 %s102_s15, 4  ;;  %s21_s16 = int_to_ptr.vmem [resolvable:$true] %s20_s16 }
   0x3   :  { %s56_s17 = scalar_lea.hbm %s18_s14, 32  ;;  %s58_s20 = scalar_lea.hbm %s135_s1, 512 }
   0x4   :  { %p57_p0 = scmp.ne.s32.totalorder %s18_s14, %s56_s17  ;;  %p59_p1 = scmp.lt.s32.totalorder %s18_s14, %s135_s1 }
   0x5   :  { %p60_p2 = scmp.lt.s32.totalorder %s58_s20, %s56_s17 }
   0x7   :  { %p61_p3 = por %p60_p2, %p59_p1 }
   0x9   :  { %p62_p4 = pnand %p61_p3, %p57_p0 }
   0xb   :  { %65 = shalt.err (!%p62_p4)
}
   0xc   :  { %s66_s0 = scalar_lea.vmem %s21_s16, 32  ;;  %p71_p6 = scmp.lt.s32.totalorder %s21_s16, %s21_s16 }
   0xd   :  { %p67_p5 = scmp.ne.s32.totalorder %s21_s16, %s66_s0  ;;  %p72_p7 = scmp.lt.s32.totalorder %s66_s0, %s66_s0 }
   0xf   :  { %p73_p8 = por %p72_p7, %p71_p6 }
  0x11   :  { %p74_p9 = pnand %p73_p8, %p67_p5 }
  0x13   :  { %77 = shalt.err (!%p74_p9)
}
  0x14   :  { %23 = dma.hbm_to_vmem [thread:$0]  %s18_s14, 32, %s21_s16, [#allocation5]  }
  0x15   :  { %98 = dma.done.wait [#allocation5], 32  }
  0x16   :  { %99 = vsyncadd [#allocation5], 4294967264  ;;  %v29_v0 = vlaneseq  ;;  %s103_s23 = smov [#allocation7]   ;;  %v28_v1 = vld [vmem:[#allocation4] sm:$0x3] }
  0x17   :  { %s40_s24 = sshll.u32 %s103_s23, 4  ;;  %s41_s24 = int_to_ptr.vmem [resolvable:$true] %s40_s24 }
  0x18   :  { %vm31_vm0 = vcmp.lt.s32.totalorder %v29_v0, 256  ;;  %s78_s1 = scalar_lea.vmem %s41_s24, 32  ;;  %p83_p11 = scmp.lt.s32.totalorder %s41_s24, %s41_s24 }
  0x19   :  { %33 = vst.msk [vmem:[#allocation7] sm:$0x3] %vm31_vm0, %v28_v1  ;;  %p79_p10 = scmp.ne.s32.totalorder %s41_s24, %s78_s1  ;;  %p84_p12 = scmp.lt.s32.totalorder %s78_s1, %s78_s1 }
  0x1b   :  { %p85_p13 = por %p84_p12, %p83_p11 }
  0x1d   :  { %p86_p0 = pnand %p85_p13, %p79_p10 }
  0x1f   :  { %89 = shalt.err (!%p86_p0)
}
  0x20   :  { %43 = dma.vmem_to_hbm [thread:$0]  %s41_s24, 32, %s136_s2, [#allocation6]  }
  0x21   :  { %100 = dma.done.wait [#allocation6], 32  }
  0x22   :  { %101 = vsyncadd [#allocation6], 4294967264 }
  0x23   :  { %47 = vsyncpa [#allocation5], 1 }
  0x24   :  { %48 = vsyncpa [#allocation6], 1 }

</bundles_post_ra>
